<compile_context>
chip_gen: v5e
topology: v5e:2x2
jax: 0.10.0
libtpu: 0.0.40
codegen_flags: <defaults>
</compile_context>

<pallas_src>
import functools

import jax
import jax.numpy as jnp
from jax import lax
from jax.experimental import pallas as pl
from jax.experimental.pallas import tpu as pltpu


_ACT_DTYPE = jnp.bfloat16          # inter-block activations / MXU operand dtype
_TILE_BUDGET_BYTES = 48 << 20      # per-step VMEM budget (v7x: 64 MiB per TC)
_VMEM_LIMIT_CAP = 64 << 20


def _round_up(x, m):
    return ((x + m - 1) // m) * m


def _block_vmem_bytes(c_in, c_out, K, t_tile, halo, head, o_dim):
    """Rough per-grid-step VMEM footprint of one TemporalBlock kernel."""
    act = jnp.dtype(_ACT_DTYPE).itemsize
    pad = _round_up(max(halo, 1), 128)
    b = 2 * c_in * t_tile * act                                   # x tile (double-buffered)
    b += (2 * o_dim * 4) if head else (2 * c_out * t_tile * act)  # output tile
    b += (K * (c_in + c_out) * c_out + c_in * c_out) * act        # weights
    if halo > 0:
        b += (c_in + c_out) * (pad + t_tile) * act                # halo/ext scratch
    b += 3 * c_out * t_tile * 4                                   # f32 temporaries
    return b


def _choose_t_tile(T, max_halo, max_c, K):
    """Largest lane-dense T tile that fits the VMEM budget and >= the halo."""
    cap = _round_up(max(T, 1), 128)
    lo = _round_up(max(max_halo, 1), 128)
    if lo >= cap:
        return cap                          # whole (padded) sequence in one tile
    for cand in (2048, 1024, 512, 256, 128):
        if lo <= cand <= cap and _block_vmem_bytes(
                max_c, max_c, K, cand, max_halo, False, 0) <= _TILE_BUDGET_BYTES:
            return cand
    return min(lo, cap)


# ----------------------------------------------------------------------------
# Pallas kernel: one fused TemporalBlock (optionally fused with the Linear head)
# ----------------------------------------------------------------------------
def _temporal_block_kernel(*refs, K, dilation, c_in, c_out, t_tile, t_tiles,
                           halo, pad, has_down, head, last_col):
    it = iter(refs)
    x_ref = next(it)
    w1_ref = next(it); b1_ref = next(it)
    w2_ref = next(it); b2_ref = next(it)
    wd_ref = next(it) if has_down else None
    bd_ref = next(it) if has_down else None
    lw_ref = next(it) if head else None
    lb_ref = next(it) if head else None
    o_ref = next(it)
    xext_ref = next(it) if halo > 0 else None
    hext_ref = next(it) if halo > 0 else None

    t = pl.program_id(1)
    x = x_ref[...]                                        # (c_in, t_tile) bf16

    def causal_conv(ext_ref, w_ref, b_ref):
        # out[:, u] = sum_j w[j] @ ext[:, pad - s_j + u]: K per-tap bf16 MXU
        # matmuls against lane-shifted views of the extended buffer (no
        # (K*C, t_tile) stacked copy), accumulated in f32.
        acc = None
        for j in range(K):
            s = (K - 1 - j) * dilation
            part = jnp.dot(w_ref[j], ext_ref[:, pad - s: pad - s + t_tile],
                           preferred_element_type=jnp.float32)
            acc = part if acc is None else acc + part
        return acc + b_ref[...]

    if halo > 0:
        @pl.when(t == 0)
        def _init_halo():
            # Causal left padding: halo region starts as zeros.
            xext_ref[:, :pad] = jnp.zeros((c_in, pad), x.dtype)
            hext_ref[:, :pad] = jnp.zeros((c_out, pad), x.dtype)

        # conv1 (causal, dilated) + ReLU
        xext_ref[:, pad:] = x
        h = jnp.maximum(causal_conv(xext_ref, w1_ref, b1_ref), 0.0)
        # TODO(synk): dropout omitted (inference/eval semantics: identity).
        hext_ref[:, pad:] = h.astype(x.dtype)
        conv2 = lambda: causal_conv(hext_ref, w2_ref, b2_ref)
    else:
        # K == 1 degenerate case: plain 1x1 convs, no halo needed.
        h = jnp.maximum(
            jnp.dot(w1_ref[0], x, preferred_element_type=jnp.float32)
            + b1_ref[...], 0.0)
        hb = h.astype(x.dtype)
        conv2 = lambda: (jnp.dot(w2_ref[0], hb, preferred_element_type=jnp.float32)
                         + b2_ref[...])

    def block_out():
        out = jnp.maximum(conv2(), 0.0)
        if has_down:                       # residual: 1x1 conv when c_in != c_out
            res = (jnp.dot(wd_ref[...], x, preferred_element_type=jnp.float32)
                   + bd_ref[...])
        else:
            res = x.astype(jnp.float32)
        return jnp.maximum(out + res, 0.0)

    if head:
        # Final block: only column T-1 is ever consumed -> skip the full
        # (c_out, Tp) HBM writeback, evaluate conv2/residual only on the last
        # tile, and apply the Linear head in-kernel -> (o_dim, 1).
        @pl.when(t == t_tiles - 1)
        def _write_head():
            y = block_out()
            col = y[:, last_col: last_col + 1]            # (c_out, 1)
            o_ref[...] = (jnp.dot(lw_ref[...], col,
                                  preferred_element_type=jnp.float32)
                          + lb_ref[...]).astype(o_ref.dtype)
    else:
        o_ref[...] = block_out().astype(o_ref.dtype)

    if halo > 0 and t_tiles > 1:
        # Carry this tile's tail as the next tile's causal halo.  Both x AND h
        # halos are carried: conv2's halo cannot be re-derived from x alone.
        xext_ref[:, pad - halo: pad] = xext_ref[:, pad + t_tile - halo: pad + t_tile]
        hext_ref[:, pad - halo: pad] = hext_ref[:, pad + t_tile - halo: pad + t_tile]


# ----------------------------------------------------------------------------
# Wrappers
# ----------------------------------------------------------------------------
def temporal_block(x, p, dilation, t_tile, valid_t, head=None):
    """Fused TemporalBlock.

    x: (B, c_in, Tp) with Tp % t_tile == 0 (bf16 activations).
    p: packed block params (see prepare_params).
    head: None, or (lw (O, c_out) f32, lb (O, 1) f32) -> fuse the y[:, :, T-1]
          gather and the Linear head; output is then (B, O, 1) f32.
    """
    B, c_in, Tp = x.shape
    K, c_out, c_in_w = p["w1k"].shape
    assert c_in_w == c_in and Tp % t_tile == 0
    t_tiles = Tp // t_tile
    halo = (K - 1) * dilation
    pad = _round_up(max(halo, 1), 128)
    assert t_tiles == 1 or halo <= t_tile, (halo, t_tile)
    has_down = "wd" in p
    fuse_head = head is not None
    last_col = (valid_t - 1) - (t_tiles - 1) * t_tile

    args = [x, p["w1k"], p["b1"], p["w2k"], p["b2"]]
    in_specs = [
        pl.BlockSpec((None, c_in, t_tile), lambda b, t: (b, 0, t)),
        pl.BlockSpec((K, c_out, c_in), lambda b, t: (0, 0, 0)),
        pl.BlockSpec((c_out, 1), lambda b, t: (0, 0)),
        pl.BlockSpec((K, c_out, c_out), lambda b, t: (0, 0, 0)),
        pl.BlockSpec((c_out, 1), lambda b, t: (0, 0)),
    ]
    if has_down:
        args += [p["wd"], p["bd"]]
        in_specs += [pl.BlockSpec((c_out, c_in), lambda b, t: (0, 0)),
                     pl.BlockSpec((c_out, 1), lambda b, t: (0, 0))]
    if fuse_head:
        lw, lb = head
        o_dim = lw.shape[0]
        args += [lw, lb]
        in_specs += [pl.BlockSpec((o_dim, c_out), lambda b, t: (0, 0)),
                     pl.BlockSpec((o_dim, 1), lambda b, t: (0, 0))]
        out_shape = jax.ShapeDtypeStruct((B, o_dim, 1), jnp.float32)
        out_spec = pl.BlockSpec((None, o_dim, 1), lambda b, t: (b, 0, 0))
    else:
        o_dim = 0
        out_shape = jax.ShapeDtypeStruct((B, c_out, Tp), x.dtype)
        out_spec = pl.BlockSpec((None, c_out, t_tile), lambda b, t: (b, 0, t))

    scratch = []
    if halo > 0:
        scratch = [pltpu.VMEM((c_in, pad + t_tile), x.dtype),
                   pltpu.VMEM((c_out, pad + t_tile), x.dtype)]

    kernel = functools.partial(
        _temporal_block_kernel, K=K, dilation=dilation, c_in=c_in, c_out=c_out,
        t_tile=t_tile, t_tiles=t_tiles, halo=halo, pad=pad,
        has_down=has_down, head=fuse_head, last_col=last_col)

    vmem_limit = int(min(max(2 * _block_vmem_bytes(c_in, c_out, K, t_tile, halo,
                                                   fuse_head, o_dim), 16 << 20),
                         _VMEM_LIMIT_CAP))

    act = jnp.dtype(x.dtype).itemsize
    flops = 2 * B * Tp * (K * c_in * c_out + K * c_out * c_out
                          + (c_in * c_out if has_down else 0))
    out_bytes = B * o_dim * 4 if fuse_head else B * c_out * Tp * act
    w_bytes = (K * (c_in + c_out) * c_out + c_in * c_out) * act
    cost = pl.CostEstimate(flops=int(flops), transcendentals=0,
                           bytes_accessed=int(B * c_in * Tp * act + out_bytes + w_bytes))

    return pl.pallas_call(
        kernel,
        out_shape=out_shape,
        grid=(B, t_tiles),
        in_specs=in_specs,
        out_specs=out_spec,
        scratch_shapes=scratch,
        compiler_params=pltpu.CompilerParams(
            dimension_semantics=("parallel", "arbitrary"),
            vmem_limit_bytes=vmem_limit),
        cost_estimate=cost,
    )(*args)


def prepare_params(params, compute_dtype=_ACT_DTYPE):
    """One-time repack of PyTorch-layout params into kernel-ready form
    (hoisted out of the hot forward): conv weights to (K, C_out, C_in) bf16,
    biases to (C, 1) f32, linear bias to (O, 1) f32."""
    blocks = []
    for p in params["blocks"]:
        c_out = p["w1"].shape[0]
        q = {
            "w1k": jnp.transpose(p["w1"], (2, 0, 1)).astype(compute_dtype),
            "b1": p["b1"].reshape(c_out, 1).astype(jnp.float32),
            "w2k": jnp.transpose(p["w2"], (2, 0, 1)).astype(compute_dtype),
            "b2": p["b2"].reshape(c_out, 1).astype(jnp.float32),
        }
        if "wd" in p:
            q["wd"] = p["wd"][:, :, 0].astype(compute_dtype)
            q["bd"] = p["bd"].reshape(c_out, 1).astype(jnp.float32)
        blocks.append(q)
    o_dim = params["lw"].shape[0]
    return {"blocks": blocks,
            "lw": params["lw"].astype(jnp.float32),
            "lb": params["lb"].reshape(o_dim, 1).astype(jnp.float32)}


def tcn_forward(x, packed, t_tile=None):
    """x: (B, input_size, T) f32 -> (B, output_size) f32."""
    B, c0, T = x.shape
    blocks = packed["blocks"]
    n = len(blocks)
    K = blocks[0]["w1k"].shape[0]
    max_halo = (K - 1) * (2 ** (n - 1))
    max_c = max([c0] + [q["w1k"].shape[1] for q in blocks])
    if t_tile is None:
        t_tile = _choose_t_tile(T, max_halo, max_c, K)
    Tp = _round_up(T, t_tile)
    # Single right-pad + bf16 cast; causality keeps columns [0, T) exact.
    y = jnp.pad(x.astype(blocks[0]["w1k"].dtype), ((0, 0), (0, 0), (0, Tp - T)))
    for i, q in enumerate(blocks):
        head = (packed["lw"], packed["lb"]) if i == n - 1 else None
        y = temporal_block(y, q, dilation=2 ** i, t_tile=t_tile,
                           valid_t=T, head=head)
    return y[:, :, 0]                     # (B, output_size, 1) -> (B, output_size)


# ----------------------------------------------------------------------------
# Deterministic parameter init (synthetic, PyTorch-like uniform fan-in scaling)
# ----------------------------------------------------------------------------
def init_params(key, input_size, output_size, num_channels, kernel_size):
    def uniform(k, shape, fan_in):
        bound = 1.0 / jnp.sqrt(fan_in)
        return jax.random.uniform(k, shape, jnp.float32, -bound, bound)

    blocks = []
    in_ch = input_size
    for out_ch in num_channels:
        key, k1, k2, k3, k4, k5, k6 = jax.random.split(key, 7)
        p = {
            "w1": uniform(k1, (out_ch, in_ch, kernel_size), in_ch * kernel_size),
            "b1": uniform(k2, (out_ch,), in_ch * kernel_size),
            "w2": uniform(k3, (out_ch, out_ch, kernel_size), out_ch * kernel_size),
            "b2": uniform(k4, (out_ch,), out_ch * kernel_size),
        }
        if in_ch != out_ch:
            p["wd"] = uniform(k5, (out_ch, in_ch, 1), in_ch)
            p["bd"] = uniform(k6, (out_ch,), in_ch)
        blocks.append(p)
        in_ch = out_ch

    key, k7, k8 = jax.random.split(key, 3)
    return {
        "blocks": blocks,
        "lw": uniform(k7, (output_size, num_channels[-1]), num_channels[-1]),
        "lb": uniform(k8, (output_size,), num_channels[-1]),
    }


# ----------------------------------------------------------------------------
# Pure-JAX f32 reference (independent implementation via conv_general_dilated)
# ----------------------------------------------------------------------------
def _ref_conv(x, w, b, dilation):
    K = w.shape[-1]
    pad = (K - 1) * dilation
    y = lax.conv_general_dilated(
        x, w, window_strides=(1,), padding=[(pad, 0)],
        rhs_dilation=(dilation,),
        dimension_numbers=("NCH", "OIH", "NCH"))
    return y + b[None, :, None]


def ref_forward(x, params):
    y = x
    for i, p in enumerate(params["blocks"]):
        d = 2 ** i
        h = jax.nn.relu(_ref_conv(y, p["w1"], p["b1"], d))
        out = jax.nn.relu(_ref_conv(h, p["w2"], p["b2"], d))
        res = _ref_conv(y, p["wd"], p["bd"], 1) if "wd" in p else y
        y = jax.nn.relu(out + res)
    return y[:, :, -1] @ params["lw"].T + params["lb"]


# ----------------------------------------------------------------------------
if __name__ == "__main__":
    B, input_size, T = 2, 4, 16
    num_channels = [8, 8]
    output_size, kernel_size = 3, 3

    key = jax.random.PRNGKey(0)
    key, kx = jax.random.split(key)
    x = jax.random.normal(kx, (B, input_size, T), jnp.float32)
    params = init_params(key, input_size, output_size, num_channels,
                         kernel_size)
    packed = prepare_params(params)          # one-time weight repack (hoisted)

    out = jax.block_until_ready(tcn_forward(x, packed))
    ref = jax.block_until_ready(ref_forward(x, params))

    assert out.shape == (B, output_size), out.shape
    # bf16 MXU operands / inter-block activations => looser tolerance vs f32 ref.
    err = jnp.max(jnp.abs(out - ref))
    assert jnp.allclose(out, ref, atol=5e-2, rtol=5e-2), \
        f"max abs err = {err}"
    print("KERNEL_OK")
</pallas_src>

<mosaic_0001>
module attributes {stable_mosaic.version = 11 : i64} {
  func.func @_temporal_block_kernel(%arg0: i32, %arg1: i32, %arg2: memref<1x4x128xbf16, #tpu.memory_space<vmem>>, %arg3: memref<3x8x4xbf16, #tpu.memory_space<vmem>>, %arg4: memref<8x1xf32, #tpu.memory_space<vmem>>, %arg5: memref<3x8x8xbf16, #tpu.memory_space<vmem>>, %arg6: memref<8x1xf32, #tpu.memory_space<vmem>>, %arg7: memref<8x4xbf16, #tpu.memory_space<vmem>>, %arg8: memref<8x1xf32, #tpu.memory_space<vmem>>, %arg9: memref<1x8x128xbf16, #tpu.memory_space<vmem>>, %arg10: memref<4x256xbf16, #tpu.memory_space<vmem>>, %arg11: memref<8x256xbf16, #tpu.memory_space<vmem>>) attributes {dimension_semantics = [#tpu.dimension_semantics<parallel>, #tpu.dimension_semantics<arbitrary>], iteration_bounds = array<i64: 2, 1>, scalar_prefetch = 0 : i64, scratch_operands = 2 : i64, tpu.core_type = #tpu.core_type<tc>, window_params = [{transform_indices = @transform_0, window_bounds = array<i64: 1, 4, 128>}, {pipeline_mode = #tpu.pipeline_mode<synchronous>, transform_indices = @transform_1, window_bounds = array<i64: 3, 8, 4>}, {pipeline_mode = #tpu.pipeline_mode<synchronous>, transform_indices = @transform_2, window_bounds = array<i64: 8, 1>}, {pipeline_mode = #tpu.pipeline_mode<synchronous>, transform_indices = @transform_3, window_bounds = array<i64: 3, 8, 8>}, {pipeline_mode = #tpu.pipeline_mode<synchronous>, transform_indices = @transform_4, window_bounds = array<i64: 8, 1>}, {pipeline_mode = #tpu.pipeline_mode<synchronous>, transform_indices = @transform_5, window_bounds = array<i64: 8, 4>}, {pipeline_mode = #tpu.pipeline_mode<synchronous>, transform_indices = @transform_6, window_bounds = array<i64: 8, 1>}, {transform_indices = @transform_7, window_bounds = array<i64: 1, 8, 128>}]} {
    %c0 = arith.constant 0 : index
    %c0_0 = arith.constant 0 : index
    %c0_1 = arith.constant 0 : index
    %0 = vector.load %arg2[%c0, %c0_0, %c0_1] : memref<1x4x128xbf16, #tpu.memory_space<vmem>>, vector<1x4x128xbf16>
    %1 = vector.shape_cast %0 : vector<1x4x128xbf16> to vector<4x128xbf16>
    %c0_i32 = arith.constant 0 : i32
    %2 = arith.cmpi eq, %arg1, %c0_i32 : i32
    %3 = arith.extui %2 : i1 to i32
    %c0_i32_2 = arith.constant 0 : i32
    %4 = arith.cmpi ne, %3, %c0_i32_2 : i32
    scf.if %4 {
      %cst_52 = arith.constant 0.000000e+00 : bf16
      %58 = vector.broadcast %cst_52 : bf16 to vector<4x128xbf16>
      %c0_53 = arith.constant 0 : index
      %c0_54 = arith.constant 0 : index
      %59 = vector.load %arg10[%c0_53, %c0_54] : memref<4x256xbf16, #tpu.memory_space<vmem>>, vector<4x128xbf16>
      tpu.vector_store %arg10[%c0_53, %c0_54], %58 {strides = array<i32>} : memref<4x256xbf16, #tpu.memory_space<vmem>>, vector<4x128xbf16>,
      %cst_55 = arith.constant 0.000000e+00 : bf16
      %60 = vector.broadcast %cst_55 : bf16 to vector<8x128xbf16>
      %c0_56 = arith.constant 0 : index
      %c0_57 = arith.constant 0 : index
      %61 = vector.load %arg11[%c0_56, %c0_57] : memref<8x256xbf16, #tpu.memory_space<vmem>>, vector<8x128xbf16>
      tpu.vector_store %arg11[%c0_56, %c0_57], %60 {strides = array<i32>} : memref<8x256xbf16, #tpu.memory_space<vmem>>, vector<8x128xbf16>,
    } else {
    }
    %c0_3 = arith.constant 0 : index
    %c128 = arith.constant 128 : index
    %5 = vector.load %arg10[%c0_3, %c128] : memref<4x256xbf16, #tpu.memory_space<vmem>>, vector<4x128xbf16>
    tpu.vector_store %arg10[%c0_3, %c128], %1 {strides = array<i32>} : memref<4x256xbf16, #tpu.memory_space<vmem>>, vector<4x128xbf16>,
    %c0_4 = arith.constant 0 : index
    %c0_5 = arith.constant 0 : index
    %c0_6 = arith.constant 0 : index
    %6 = vector.load %arg3[%c0_4, %c0_5, %c0_6] : memref<3x8x4xbf16, #tpu.memory_space<vmem>>, vector<1x8x4xbf16>
    %7 = vector.shape_cast %6 : vector<1x8x4xbf16> to vector<8x4xbf16>
    %c0_7 = arith.constant 0 : index
    %c126 = arith.constant 126 : index
    %8 = vector.load %arg10[%c0_7, %c126] : memref<4x256xbf16, #tpu.memory_space<vmem>>, vector<4x128xbf16>
    %cst = arith.constant dense<0.000000e+00> : vector<8x128xf32>
    %9 = tpu.matmul %7, %8, %cst {dimension_numbers = #tpu.dot_dimension_numbers<[1], [0], [0], [1], [0, 0, 1, 1], [], []>} : vector<8x4xbf16>, vector<4x128xbf16>, vector<8x128xf32> -> vector<8x128xf32>
    %c1 = arith.constant 1 : index
    %c0_8 = arith.constant 0 : index
    %c0_9 = arith.constant 0 : index
    %10 = vector.load %arg3[%c1, %c0_8, %c0_9] : memref<3x8x4xbf16, #tpu.memory_space<vmem>>, vector<1x8x4xbf16>
    %11 = vector.shape_cast %10 : vector<1x8x4xbf16> to vector<8x4xbf16>
    %c0_10 = arith.constant 0 : index
    %c127 = arith.constant 127 : index
    %12 = vector.load %arg10[%c0_10, %c127] : memref<4x256xbf16, #tpu.memory_space<vmem>>, vector<4x128xbf16>
    %cst_11 = arith.constant dense<0.000000e+00> : vector<8x128xf32>
    %13 = tpu.matmul %11, %12, %cst_11 {dimension_numbers = #tpu.dot_dimension_numbers<[1], [0], [0], [1], [0, 0, 1, 1], [], []>} : vector<8x4xbf16>, vector<4x128xbf16>, vector<8x128xf32> -> vector<8x128xf32>
    %14 = arith.addf %9, %13 : vector<8x128xf32>
    %c2 = arith.constant 2 : index
    %c0_12 = arith.constant 0 : index
    %c0_13 = arith.constant 0 : index
    %15 = vector.load %arg3[%c2, %c0_12, %c0_13] : memref<3x8x4xbf16, #tpu.memory_space<vmem>>, vector<1x8x4xbf16>
    %16 = vector.shape_cast %15 : vector<1x8x4xbf16> to vector<8x4xbf16>
    %c0_14 = arith.constant 0 : index
    %c128_15 = arith.constant 128 : index
    %17 = vector.load %arg10[%c0_14, %c128_15] : memref<4x256xbf16, #tpu.memory_space<vmem>>, vector<4x128xbf16>
    %cst_16 = arith.constant dense<0.000000e+00> : vector<8x128xf32>
    %18 = tpu.matmul %16, %17, %cst_16 {dimension_numbers = #tpu.dot_dimension_numbers<[1], [0], [0], [1], [0, 0, 1, 1], [], []>} : vector<8x4xbf16>, vector<4x128xbf16>, vector<8x128xf32> -> vector<8x128xf32>
    %19 = arith.addf %14, %18 : vector<8x128xf32>
    %c0_17 = arith.constant 0 : index
    %c0_18 = arith.constant 0 : index
    %20 = vector.load %arg4[%c0_17, %c0_18] : memref<8x1xf32, #tpu.memory_space<vmem>>, vector<8x1xf32>
    %21 = vector.broadcast %20 : vector<8x1xf32> to vector<8x128xf32>
    %22 = arith.addf %19, %21 : vector<8x128xf32>
    %cst_19 = arith.constant 0.000000e+00 : f32
    %23 = vector.broadcast %cst_19 : f32 to vector<8x128xf32>
    %24 = arith.maximumf %22, %23 : vector<8x128xf32>
    %25 = arith.truncf %24 : vector<8x128xf32> to vector<8x128xbf16>
    %c0_20 = arith.constant 0 : index
    %c128_21 = arith.constant 128 : index
    %26 = vector.load %arg11[%c0_20, %c128_21] : memref<8x256xbf16, #tpu.memory_space<vmem>>, vector<8x128xbf16>
    tpu.vector_store %arg11[%c0_20, %c128_21], %25 {strides = array<i32>} : memref<8x256xbf16, #tpu.memory_space<vmem>>, vector<8x128xbf16>,
    %c0_22 = arith.constant 0 : index
    %c0_23 = arith.constant 0 : index
    %c0_24 = arith.constant 0 : index
    %27 = vector.load %arg5[%c0_22, %c0_23, %c0_24] : memref<3x8x8xbf16, #tpu.memory_space<vmem>>, vector<1x8x8xbf16>
    %28 = vector.shape_cast %27 : vector<1x8x8xbf16> to vector<8x8xbf16>
    %c0_25 = arith.constant 0 : index
    %c126_26 = arith.constant 126 : index
    %29 = vector.load %arg11[%c0_25, %c126_26] : memref<8x256xbf16, #tpu.memory_space<vmem>>, vector<8x128xbf16>
    %cst_27 = arith.constant dense<0.000000e+00> : vector<8x128xf32>
    %30 = tpu.matmul %28, %29, %cst_27 {dimension_numbers = #tpu.dot_dimension_numbers<[1], [0], [0], [1], [0, 0, 1, 1], [], []>} : vector<8x8xbf16>, vector<8x128xbf16>, vector<8x128xf32> -> vector<8x128xf32>
    %c1_28 = arith.constant 1 : index
    %c0_29 = arith.constant 0 : index
    %c0_30 = arith.constant 0 : index
    %31 = vector.load %arg5[%c1_28, %c0_29, %c0_30] : memref<3x8x8xbf16, #tpu.memory_space<vmem>>, vector<1x8x8xbf16>
    %32 = vector.shape_cast %31 : vector<1x8x8xbf16> to vector<8x8xbf16>
    %c0_31 = arith.constant 0 : index
    %c127_32 = arith.constant 127 : index
    %33 = vector.load %arg11[%c0_31, %c127_32] : memref<8x256xbf16, #tpu.memory_space<vmem>>, vector<8x128xbf16>
    %cst_33 = arith.constant dense<0.000000e+00> : vector<8x128xf32>
    %34 = tpu.matmul %32, %33, %cst_33 {dimension_numbers = #tpu.dot_dimension_numbers<[1], [0], [0], [1], [0, 0, 1, 1], [], []>} : vector<8x8xbf16>, vector<8x128xbf16>, vector<8x128xf32> -> vector<8x128xf32>
    %35 = arith.addf %30, %34 : vector<8x128xf32>
    %c2_34 = arith.constant 2 : index
    %c0_35 = arith.constant 0 : index
    %c0_36 = arith.constant 0 : index
    %36 = vector.load %arg5[%c2_34, %c0_35, %c0_36] : memref<3x8x8xbf16, #tpu.memory_space<vmem>>, vector<1x8x8xbf16>
    %37 = vector.shape_cast %36 : vector<1x8x8xbf16> to vector<8x8xbf16>
    %c0_37 = arith.constant 0 : index
    %c128_38 = arith.constant 128 : index
    %38 = vector.load %arg11[%c0_37, %c128_38] : memref<8x256xbf16, #tpu.memory_space<vmem>>, vector<8x128xbf16>
    %cst_39 = arith.constant dense<0.000000e+00> : vector<8x128xf32>
    %39 = tpu.matmul %37, %38, %cst_39 {dimension_numbers = #tpu.dot_dimension_numbers<[1], [0], [0], [1], [0, 0, 1, 1], [], []>} : vector<8x8xbf16>, vector<8x128xbf16>, vector<8x128xf32> -> vector<8x128xf32>
    %40 = arith.addf %35, %39 : vector<8x128xf32>
    %c0_40 = arith.constant 0 : index
    %c0_41 = arith.constant 0 : index
    %41 = vector.load %arg6[%c0_40, %c0_41] : memref<8x1xf32, #tpu.memory_space<vmem>>, vector<8x1xf32>
    %42 = vector.broadcast %41 : vector<8x1xf32> to vector<8x128xf32>
    %43 = arith.addf %40, %42 : vector<8x128xf32>
    %cst_42 = arith.constant 0.000000e+00 : f32
    %44 = vector.broadcast %cst_42 : f32 to vector<8x128xf32>
    %45 = arith.maximumf %43, %44 : vector<8x128xf32>
    %c0_43 = arith.constant 0 : index
    %c0_44 = arith.constant 0 : index
    %46 = vector.load %arg7[%c0_43, %c0_44] : memref<8x4xbf16, #tpu.memory_space<vmem>>, vector<8x4xbf16>
    %cst_45 = arith.constant dense<0.000000e+00> : vector<8x128xf32>
    %47 = tpu.matmul %46, %1, %cst_45 {dimension_numbers = #tpu.dot_dimension_numbers<[1], [0], [0], [1], [0, 0, 1, 1], [], []>} : vector<8x4xbf16>, vector<4x128xbf16>, vector<8x128xf32> -> vector<8x128xf32>
    %c0_46 = arith.constant 0 : index
    %c0_47 = arith.constant 0 : index
    %48 = vector.load %arg8[%c0_46, %c0_47] : memref<8x1xf32, #tpu.memory_space<vmem>>, vector<8x1xf32>
    %49 = vector.broadcast %48 : vector<8x1xf32> to vector<8x128xf32>
    %50 = arith.addf %47, %49 : vector<8x128xf32>
    %51 = arith.addf %45, %50 : vector<8x128xf32>
    %cst_48 = arith.constant 0.000000e+00 : f32
    %52 = vector.broadcast %cst_48 : f32 to vector<8x128xf32>
    %53 = arith.maximumf %51, %52 : vector<8x128xf32>
    %54 = arith.truncf %53 : vector<8x128xf32> to vector<8x128xbf16>
    %c0_49 = arith.constant 0 : index
    %c0_50 = arith.constant 0 : index
    %c0_51 = arith.constant 0 : index
    %55 = vector.load %arg9[%c0_49, %c0_50, %c0_51] : memref<1x8x128xbf16, #tpu.memory_space<vmem>>, vector<1x8x128xbf16>
    %56 = vector.shape_cast %55 : vector<1x8x128xbf16> to vector<8x128xbf16>
    %57 = vector.shape_cast %54 : vector<8x128xbf16> to vector<1x8x128xbf16>
    tpu.vector_store %arg9[%c0_49, %c0_50, %c0_51], %57 {strides = array<i32>} : memref<1x8x128xbf16, #tpu.memory_space<vmem>>, vector<1x8x128xbf16>,
    return
  }
  func.func @transform_0(%arg0: i32, %arg1: i32) -> (i32, i32, i32) {
    %c0_i32 = arith.constant 0 : i32
    %c0_i32_0 = arith.constant 0 : i32
    return %arg0, %c0_i32, %arg1 : i32, i32, i32
  }
  func.func @transform_1(%arg0: i32, %arg1: i32) -> (i32, i32, i32) {
    %c0_i32 = arith.constant 0 : i32
    %c0_i32_0 = arith.constant 0 : i32
    %c0_i32_1 = arith.constant 0 : i32
    %c0_i32_2 = arith.constant 0 : i32
    return %c0_i32, %c0_i32_0, %c0_i32_1 : i32, i32, i32
  }
  func.func @transform_2(%arg0: i32, %arg1: i32) -> (i32, i32) {
    %c0_i32 = arith.constant 0 : i32
    %c0_i32_0 = arith.constant 0 : i32
    %c0_i32_1 = arith.constant 0 : i32
    return %c0_i32, %c0_i32_0 : i32, i32
  }
  func.func @transform_3(%arg0: i32, %arg1: i32) -> (i32, i32, i32) {
    %c0_i32 = arith.constant 0 : i32
    %c0_i32_0 = arith.constant 0 : i32
    %c0_i32_1 = arith.constant 0 : i32
    %c0_i32_2 = arith.constant 0 : i32
    return %c0_i32, %c0_i32_0, %c0_i32_1 : i32, i32, i32
  }
  func.func @transform_4(%arg0: i32, %arg1: i32) -> (i32, i32) {
    %c0_i32 = arith.constant 0 : i32
    %c0_i32_0 = arith.constant 0 : i32
    %c0_i32_1 = arith.constant 0 : i32
    return %c0_i32, %c0_i32_0 : i32, i32
  }
  func.func @transform_5(%arg0: i32, %arg1: i32) -> (i32, i32) {
    %c0_i32 = arith.constant 0 : i32
    %c0_i32_0 = arith.constant 0 : i32
    %c0_i32_1 = arith.constant 0 : i32
    return %c0_i32, %c0_i32_0 : i32, i32
  }
  func.func @transform_6(%arg0: i32, %arg1: i32) -> (i32, i32) {
    %c0_i32 = arith.constant 0 : i32
    %c0_i32_0 = arith.constant 0 : i32
    %c0_i32_1 = arith.constant 0 : i32
    return %c0_i32, %c0_i32_0 : i32, i32
  }
  func.func @transform_7(%arg0: i32, %arg1: i32) -> (i32, i32, i32) {
    %c0_i32 = arith.constant 0 : i32
    %c0_i32_0 = arith.constant 0 : i32
    return %arg0, %c0_i32, %arg1 : i32, i32, i32
  }
}

</mosaic_0001>

<bundles_post_ra>
// kernel: tpu_custom_call.1
= control target key start
LH: loop header
LB: loop body
LE: loop exit
PB: predicated region body
PF: predicated region fallthrough
CT: control target
= control target key end

     0   :  { %12 = vsyncpa [#allocation5], 0  ;;  %s979_s0 = inlined_call_operand.vmem [shape: bf16[2,4,128], index: 0, kind: input, shape index: {}]   ;;  %s980_s1 = inlined_call_operand.vmem [shape: bf16[3,8,4], index: 1, kind: input, shape index: {}]   ;;  %s981_s2 = inlined_call_operand.vmem [shape: f32[8,1], index: 2, kind: input, shape index: {}]   ;;  %s982_s3 = inlined_call_operand.vmem [shape: bf16[3,8,8], index: 3, kind: input, shape index: {}]   ;;  %s983_s4 = inlined_call_operand.vmem [shape: f32[8,1], index: 4, kind: input, shape index: {}]   ;;  %s984_s5 = inlined_call_operand.vmem [shape: bf16[8,4], index: 5, kind: input, shape index: {}]   ;;  %s985_s6 = inlined_call_operand.vmem [shape: f32[8,1], index: 6, kind: input, shape index: {}]   ;;  %s986_s7 = inlined_call_operand.hbm [shape: bf16[2,8,128], index: 7, kind: output, shape index: {}]  }
   0x1   :  { %14 = vsyncpa [#allocation5 + $0x1], 0  ;;  %s822_s24 = smov 0   ;;  %s824_s25 = smov 0  }
   0x2   :  { %s826_s26 = smov 0   ;;  %s828_s27 = smov 0  }
   0x3   :  { %s830_s28 = smov 0   ;;  %s832_s29 = smov 0  }
   0x4 LB: > { %s616_s30 = sadd.s32 4294967295, %s777_s29   ;;  %s617_s8 = sadd.s32 4294967294, %s777_s29   ;;  %s777_s29 = sphi %s832_s29, %s20_s29   ;;  %s773_s28 = sphi %s830_s28, %s993_s28   ;;  %s769_s27 = sphi %s828_s27, %s992_s27   ;;  %s765_s26 = sphi %s826_s26, %s991_s26   ;;  %s761_s25 = sphi %s824_s25, %s990_s25   ;;  %s757_s24 = sphi %s822_s24, %s989_s24  }
   0x5   : > { %s32_s9 = sadd.s32 1, %s773_s28  ;;  %s195_s10 = sadd.s32 1, %s765_s26 }
   0x6   : > { %p34_p0 = scmp.ge.s32.totalorder %s32_s9, 2  ;;  %p205_p1 = scmp.ne.s32.totalorder %s765_s26, %s761_s25 }
   0x7   : > { %p206_p2 = scmp.eq.s32.totalorder %s616_s30, 1  ;;  %p211_p3 = scmp.ne.s32.totalorder %s761_s25, %s757_s24 }
   0x8   : > { %s995_s9 = smov (%p34_p0, %s32_s9), 0  ;;  %p212_p5 = scmp.eq.s32.totalorder %s617_s8, 1 }
   0x9   : > { %p862_p4 = por %p206_p2, %p205_p1  ;;  %s190_s12 = ssub.s32 %s773_s28, %s995_s9 }
   0xa   : > { %p620_p6 = scmp.ge.s32.totalorder %s777_s29, 1  ;;  %p193_p7 = scmp.eq.s32.totalorder %s190_s12, 0 }
   0xb   : > { %p869_p8 = por %p212_p5, %p211_p3  ;;  %p258_p9 = scmp.lt.s32.totalorder %s777_s29, 3 }
   0xc   : > { %s875_s14 = scalar_select %p193_p7, %s765_s26, %s195_s10  }
   0xd   : > { %p259_p10 = pnand %p620_p6, %p258_p9 }
   0xe   : > { %p292_p11 = scmp.lt.s32.totalorder (!%p259_p10), %s769_s27, 1  ;;  %s780_s20 = smov (!%p259_p10), 1  }
   0xf   : > { %262 = sbr.rel (%p259_p10) target bundleno = 595 (0x253), region = 48  ;;  %s781_s21 = smov (!%p259_p10), 2  }
  0x10   : > { %s635_s18 = sshll.u32 (!%p259_p10), %s769_s27, 2 }
  0x11   : > { %s540_s23 = scalar_lea.hbm (!%p259_p10), %s986_s7, %s635_s18  ;;  %s719_s18 = scalar_lea.hbm (!%p259_p10), %s986_s7, 8 }
  0x14   : > { %v779_v0 = vmov 0   ;;  %s293_s15 = scalar_select %p292_p11, %s769_s27, 1  ;;  %vm328_vm0 = vcmask 1041408   ;;  %vm324_vm1 = vcmask 31744   ;;  %v626_v9 = vld [vmem:[%s980_s1 + $0x8] sm:$0xf] }
  0x15   : > { %305 = vst [vmem:[#allocation2] sm:$0x3] %v779_v0  ;;  %696 = vset.pattern.permute.xlu2 %v779_v0  ;;  %697 = vset.pattern.permute.xlu0 %v779_v0  ;;  %v398_v10 = vld [vmem:[%s981_s2] sm:$0xff]  ;;  %vm322_vm2 = vcmask 7168   ;;  %vm354_vm3 = vcmask 15360   ;;  %vm426_vm4 = vcmask 1043456  }
  0x16   : > { %306 = vst [vmem:[#allocation3] sm:$0xf] %v779_v0  ;;  %698 = vset.pattern.permute.xlu1 %v779_v0  ;;  %s622_s16 = sshll.u32 %s293_s15, 1  ;;  %401 = vperm.xlu2 %696, %v398_v10   ;;  %v623_v16 = vld [vmem:[%s980_s1 + $0x4] sm:$0xf]  ;;  %vm422_vm5 = vcmask 64512  }
  0x17   : > { %s298_s19 = scalar_lea.vmem %s979_s0, %s622_s16  ;;  %v308_v20 = vld [vmem:[%s980_s1] sm:$0xf]  ;;  %v631_v42 = vld [vmem:[%s982_s3 + $0x8] sm:$0xf]  ;;  %v628_v53 = vld [vmem:[%s982_s3 + $0x4] sm:$0xf] }
  0x18   : > { %v882_v1 = vld [vmem:[%s298_s19] sm:$0x3]  ;;  %s289_s16 = sand.u32 1, %s761_s25  }
  0x19   : > { %307 = vst [vmem:[#allocation2 + $0x2] sm:$0x3] %v882_v1  ;;  %v509_v40 = vsel %vm328_vm0, %v882_v1, 0  ;;  %v498_v41 = vld [vmem:[%s984_s5] sm:$0xf]  ;;  %s621_s17 = sshll.u32 %s289_s16, 2 }
  0x1a   : > { %v490_v43 = vld [vmem:[%s983_s4] sm:$0xff]  ;;  %s291_s30 = scalar_lea.vmem [#allocation4], %s621_s17  ;;  %s529_s8 = scalar_lea.sflag [#allocation5], %s289_s16 }
  0x1b   : > { %v499_v44 = vld [vmem:[%s985_s6] sm:$0xff] }
  0x1c   : > { %v408_v54 = vld [vmem:[%s982_s3] sm:$0xf] }
  0x20   : > { %v309_v2 = vld [vmem:[#allocation2] sm:$0xf] }
  0x21   : > { %313 = vst [vmem:[#allocation1] ss:$4 sm:$0xff] %v309_v2  ;;  %v377_v7 = vld [vmem:[#allocation2 + $0x2] sm:$0x3] }
  0x22   : > { %v382_v8 = vsel %vm328_vm0, %v377_v7, 0 }
  0x23   : > { %391 = vmatpush.bf16.msra.mxu2 %v382_v8 }
  0x26   : > { %627 = vmatmul.msk.bf16.vlgmr.msra.gmra.mxu2 %vm324_vm1, %v626_v9 }
  0x27   : > { %518 = vmatpush.bf16.msrb.mxu2 %v509_v40 }
  0x28   : > { %v314_v3 = vld.sshfl [vmem:[#allocation1] sm:$0xff pattern:$0x73625140]  ;;  %v316_v4 = vld.sshfl [vmem:[#allocation1 + $0x8] sm:$0xff pattern:$0x73625140] }
  0x29   : > { %318 = vrot.lane.b32.xlu0 %v314_v3, %s780_s20  ;;  %345 = vst [vmem:[#allocation1] ss:$4 sm:$0xff] %v309_v2 }
  0x30   : > { %v346_v5 = vld.sshfl [vmem:[#allocation1] sm:$0xff pattern:$0x73625140]  ;;  %v348_v6 = vld.sshfl [vmem:[#allocation1 + $0x8] sm:$0xff pattern:$0x73625140] }
  0x31   : > { %320 = vrot.lane.b32.xlu0 %v316_v4, %s780_s20  ;;  %350 = vrot.lane.b32.xlu1 %v346_v5, %s781_s21 }
  0x36   : > { %633 = vmatmul.msk.bf16.vlgmr.msrb.gmra.mxu2 %vm324_vm1, %v498_v41 }
  0x39   : > { %352 = vrot.lane.b32.xlu1 %v348_v6, %s781_s21 }
  0x70   : > { %v402_v27 = vpop.permute.xlu2 %401 }
  0x9b   : > { %v319_v11 = vpop.permute.xlu0 %318 }
  0xa3   : > { %v321_v12 = vpop.permute.xlu0 %320  ;;  %v351_v13 = vpop.permute.xlu1 %350 }
  0xa4   : > { %v323_v14 = vsel %vm322_vm2, %v319_v11, %v321_v12 }
  0xa5   : > { %v330_v15 = vsel %vm328_vm0, %v323_v14, 0 }
  0xa6   : > { %339 = vmatpush.bf16.msra.mxu0 %v330_v15 }
  0xa9   : > { %624 = vmatmul.msk.bf16.vlgmr.msra.gmra.mxu0 %vm324_vm1, %v623_v16  ;;  %v393_v21 = vpop.f32.mrf.mxu2 }
  0xab   : > { %v353_v17 = vpop.permute.xlu1 %352 }
  0xac   : > { %v355_v18 = vsel %vm354_vm3, %v351_v13, %v353_v17 }
  0xad   : > { %v360_v19 = vsel %vm328_vm0, %v355_v18, 0 }
  0xae   : > { %369 = vmatpush.bf16.msra.mxu1 %v360_v19 }
  0xb1   : > { %625 = vmatmul.msk.bf16.vlgmr.msra.gmra.mxu1 %vm324_vm1, %v308_v20  ;;  %v395_v22 = vpop.f32.mrf.mxu2 }
  0xb9   : > { %v520_v56 = vpop.f32.mrf.mxu2 }
  0xc1   : > { %v522_v58 = vpop.f32.mrf.mxu2 }
 0x126   : > { %v341_v23 = vpop.f32.mrf.mxu0 }
 0x12e   : > { %v343_v24 = vpop.f32.mrf.mxu0  ;;  %v371_v25 = vpop.f32.mrf.mxu1 }
 0x12f   : > { %v372_v26 = vadd.f32 %v371_v25, %v341_v23 }
 0x131   : > { %v397_v28 = vadd.f32 %v393_v21, %v372_v26 }
 0x133   : > { %v404_v29 = vadd.f32 %v402_v27, %v397_v28 }
 0x135   : > { %v405_v30 = vmax.f32 %v404_v29, 0.0 }
 0x136   : > { %v373_v31 = vpop.f32.mrf.mxu1 }
 0x137   : > { %v406_v32 = vpack.c.bf16 %v405_v30, %v405_v30 }
 0x139   : > { %407 = vst [vmem:[#allocation3 + $0x4] sm:$0xf] %v406_v32 }
 0x140   : > { %v469_v33 = vld [vmem:[#allocation3 + $0x4] sm:$0xf] }
 0x141   : > { %v409_v34 = vld [vmem:[#allocation3] sm:$0xff]  ;;  %v474_v35 = vsel %vm426_vm4, %v469_v33, 0 }
 0x142   : > { %v414_v36 = vunpack.c.h.b16 %v409_v34  ;;  %v413_v37 = vunpack.c.l.b16 %v409_v34  ;;  %483 = vmatpush.bf16.msrb.mxu1 %v474_v35 }
 0x144   : > { %v416_v38 = vpack.c.b16 %v414_v36, %v414_v36  ;;  %v415_v39 = vpack.c.b16 %v413_v37, %v413_v37 }
 0x145   : > { %632 = vmatmul.msk.bf16.vlgmr.msrb.gmra.mxu1 %vm422_vm5, %v631_v42 }
 0x146   : > { %419 = vrot.lane.b32.xlu0 %v416_v38, %s780_s20  ;;  %443 = vrot.lane.b32.xlu1 %v415_v39, %s781_s21 }
 0x147   : > { %417 = vrot.lane.b32.xlu2 %v415_v39, %s780_s20  ;;  %s542_s20 = sshll.u32 %s291_s30, 4  ;;  %s543_s20 = int_to_ptr.vmem [resolvable:$true] %s542_s20 }
 0x14e   : > { %493 = vperm.xlu0 %697, %v490_v43   ;;  %502 = vperm.xlu1 %698, %v499_v44  }
 0x14f   : > { %445 = vrot.lane.b32.xlu2 %v416_v38, %s781_s21  ;;  %s544_s21 = sshll.u32 %s540_s23, 4  ;;  %s545_s21 = int_to_ptr.hbm [resolvable:$true] %s544_s21 }
 0x150   : > { %s713_s27 = sshra.s32 %s545_s21, 4  ;;  %s714_s27 = int_to_ptr.hbm [resolvable:$true] %s713_s27 }
 0x151   : > { %s715_s10 = scalar_lea.hbm %s714_s27, 4  ;;  %p720_p1 = scmp.lt.s32.totalorder %s714_s27, %s986_s7 }
 0x152   : > { %p716_p12 = scmp.ne.s32.totalorder %s714_s27, %s715_s10  ;;  %p721_p2 = scmp.lt.s32.totalorder %s719_s18, %s715_s10 }
 0x154   : > { %p717_p13 = pnand %p716_p12, %p862_p4  ;;  %p722_p3 = por %p721_p2, %p720_p1 }
 0x156   : > { %p718_p0 = pneg %p717_p13 }
 0x158   : > { %p723_p5 = pnand %p722_p3, %p718_p0 }
 0x1a1   : > { %v418_v45 = vpop.permute.xlu2 %417 }
 0x1a9   : > { %v446_v46 = vpop.permute.xlu2 %445 }
 0x1b8   : > { %v420_v47 = vpop.permute.xlu0 %419  ;;  %v444_v48 = vpop.permute.xlu1 %443 }
 0x1b9   : > { %v421_v49 = vsel %vm322_vm2, %v418_v45, %v420_v47  ;;  %v447_v50 = vsel %vm354_vm3, %v444_v48, %v446_v46 }
 0x1ba   : > { %v428_v51 = vsel %vm426_vm4, %v421_v49, 0  ;;  %v452_v52 = vsel %vm426_vm4, %v447_v50, 0 }
 0x1bb   : > { %437 = vmatpush.bf16.msra.mxu3 %v428_v51  ;;  %461 = vmatpush.bf16.msrb.mxu0 %v452_v52 }
 0x1be   : > { %629 = vmatmul.msk.bf16.vlgmr.msra.gmra.mxu3 %vm422_vm5, %v628_v53  ;;  %630 = vmatmul.msk.bf16.vlgmr.msrb.gmra.mxu0 %vm422_vm5, %v408_v54 }
 0x1c0   : > { %v494_v62 = vpop.permute.xlu0 %493  ;;  %v503_v0 = vpop.permute.xlu1 %502 }
 0x1c1   : > { %v521_v3 = vadd.f32 %v520_v56, %v503_v0 }
 0x1c2   : > { %v485_v55 = vpop.f32.mrf.mxu1 }
 0x1ca   : > { %v487_v57 = vpop.f32.mrf.mxu1 }
 0x23b   : > { %v463_v59 = vpop.f32.mrf.mxu0 }
 0x241   : > { %v439_v60 = vpop.f32.mrf.mxu3 }
 0x242   : > { %v464_v61 = vadd.f32 %v463_v59, %v439_v60 }
 0x243   : > { %v465_v63 = vpop.f32.mrf.mxu0 }
 0x244   : > { %v489_v1 = vadd.f32 %v485_v55, %v464_v61 }
 0x246   : > { %v496_v2 = vadd.f32 %v494_v62, %v489_v1 }
 0x248   : > { %v497_v4 = vmax.f32 %v496_v2, 0.0 }
 0x249   : > { %v441_v5 = vpop.f32.mrf.mxu3 }
 0x24a   : > { %v524_v6 = vadd.f32 %v521_v3, %v497_v4 }
 0x24c   : > { %v525_v7 = vmax.f32 %v524_v6, 0.0 }
 0x24e   : > { %v526_v8 = vpack.c.bf16 %v525_v7, %v525_v7 }
 0x250   : > { %527 = vst [vmem:[%s291_s30] sm:$0xf] %v526_v8 }
 0x251   : > { %726 = shalt.err (!%p723_p5)
}
 0x252   : > { %638 = dma.vmem_to_hbm [thread:$0]  (%p862_p4), %s543_s20, 64, %s545_s21, %s529_s8  }
 0x253 PF: > { %p644_p6 = scmp.ge.s32.totalorder %s777_s29, 2  ;;  %s556_s16 = sand.u32 1, %s757_s24  }
 0x254   : > { %s557_s22 = scalar_lea.sflag [#allocation5], %s556_s16 }
 0x255   : > { %p641_p7 = pnand %p644_p6, %p869_p8 }
 0x257   : > { %p642_p9 = pneg %p641_p7 }
 0x259   : > { %752 = dma.done.wait (%p642_p9), %s557_s22, 64  }
 0x25a   : > { %754 = vsyncadd (%p642_p9), %s557_s22, 4294967232  ;;  %s20_s29 = sadd.s32 1, %s777_s29   ;;  %s989_s24 = smov %s761_s25 }
 0x25b   : > { %p17_p10 = scmp.ge.s32.totalorder %s20_s29, 4   ;;  %s990_s25 = smov %s765_s26 }
 0x25c   : > { %s991_s26 = smov %s875_s14  ;;  %s992_s27 = smov %s773_s28 }
 0x25d   : > { %s993_s28 = smov %s995_s9  ;;  %19 = sbr.rel (!%p17_p10) target bundleno = 4 (0x4), region = 91 }
 0x262   :  { %563 = vsyncpa [#allocation5], 1 }
 0x263   :  { %565 = vsyncpa [#allocation5 + $0x1], 1 }

</bundles_post_ra>
